<compile_context>
chip_gen: v7x
topology: tpu7x:2x2x1
jax: 0.10.0
libtpu: 0.0.40
codegen_flags: <defaults>
</compile_context>

<pallas_src>
import functools

import jax
import jax.numpy as jnp
from jax.experimental import pallas as pl
from jax.experimental.pallas import tpu as pltpu


# ---------------------------------------------------------------------------
# Kernel: fused gather (as masked lane-wise accumulation) + copy-loss epilogue
# ---------------------------------------------------------------------------
def _copy_loss_kernel(scores_ref, target_ref, align_ref, loss_ref,
                      vsum_ref, csum_ref, *,
                      vocab_size, unk_index, ignore_index, eps, force_copy):
    j = pl.program_id(1)                      # vocab-tile index (reduction axis, innermost)
    tv = scores_ref.shape[1]                  # static tile width (multiple of 128, or Vd<128)

    @pl.when(j == 0)
    def _():
        vsum_ref[...] = jnp.zeros_like(vsum_ref)
        csum_ref[...] = jnp.zeros_like(csum_ref)

    s = scores_ref[...].astype(jnp.float32)   # [tn, tv]
    tgt = target_ref[...]                     # [tn, 1] int32
    aln = align_ref[...]                      # [tn, 1] int32

    # Hoist the grid offset onto the per-row scalars; the iota is loop-invariant.
    base = j * tv
    tgt_local = tgt - base                    # [tn, 1]
    cpy_local = aln + vocab_size - base       # [tn, 1]
    col = jax.lax.broadcasted_iota(jnp.int32, s.shape, 1)   # [tn, tv], loop-invariant

    # Gather-by-mask: at most one column matches per row across the whole vocab axis.
    # Ragged last tile: garbage columns have local index >= (Vd - base) which can never
    # equal a valid local target/copy index, so they are masked out automatically.
    v_masked = jnp.where(col == tgt_local, s, 0.0)           # [tn, tv]
    c_masked = jnp.where(col == cpy_local, s, 0.0)           # [tn, tv]

    # Lane-dense accumulation: fold tv lanes into an acc_w(=128)-wide accumulator with
    # pure VPU adds (128-lane-aligned static slices => no copies, no XLU per step).
    acc_w = vsum_ref.shape[1]
    n_chunks = tv // acc_w
    vacc = vsum_ref[...]
    cacc = csum_ref[...]
    for k in range(n_chunks):
        sl = slice(k * acc_w, (k + 1) * acc_w)
        vacc = vacc + v_masked[:, sl]
        cacc = cacc + c_masked[:, sl]
    vsum_ref[...] = vacc
    csum_ref[...] = cacc

    @pl.when(j == pl.num_programs(1) - 1)
    def _():
        # Single cross-lane reduce per row tile (epilogue only).
        vocab_probs = jnp.sum(vsum_ref[...], axis=1, keepdims=True)   # [tn, 1]
        copy_sum = jnp.sum(csum_ref[...], axis=1, keepdims=True)      # [tn, 1]

        is_unk_align = aln == unk_index
        copy_tok = jnp.where(is_unk_align, 0.0, copy_sum) + eps

        non_copy = is_unk_align
        if not force_copy:                    # trace-time Python bool
            non_copy = non_copy | (tgt != unk_index)

        probs = jnp.where(non_copy, copy_tok + vocab_probs, copy_tok)
        loss = -jnp.log(probs)
        loss = jnp.where(tgt == ignore_index, 0.0, loss)
        loss_ref[...] = loss                  # [tn, 1]


# ---------------------------------------------------------------------------
# Wrapper reproducing CopyGeneratorLoss.forward
# ---------------------------------------------------------------------------
def copy_generator_loss(scores, align, target, *, vocab_size, force_copy,
                        unk_index=0, ignore_index=-100, eps=1e-20,
                        row_tile=256, vocab_tile=2048):
    """scores: [N, Vd] float, align/target: [N] int -> loss [N] float32."""
    N, Vd = scores.shape
    target2 = target.reshape(N, 1).astype(jnp.int32)
    align2 = align.reshape(N, 1).astype(jnp.int32)

    # Row tile: multiple of 16 (bf16-safe sublane tile), capped, and split so the parallel
    # row axis has >= 2 tiles when N allows (v7x megacore). Never exceeds N.
    if N < 16:
        tn = max(N, 1)
    else:
        tn = min(row_tile, max(16, ((N // 2) // 16) * 16))

    # Vocab tile: fixed lane-dense width (multiple of 128, <= vocab_tile), never exceeding
    # Vd; cdiv raggedness is handled by the masks in the kernel. Footprint at the default
    # (256 x 2048 f32) is 2 MiB per scores block, 4 MiB double-buffered.
    if Vd < 128:
        tv = Vd                                   # equals full lane dim (allowed)
    elif Vd % 128 == 0:
        tv = min(vocab_tile, Vd)
    else:
        tv = min(vocab_tile, (Vd // 128) * 128)   # multiple of 128, last tile ragged
    acc_w = tv if tv < 128 else 128

    grid = (pl.cdiv(N, tn), pl.cdiv(Vd, tv))

    kernel = functools.partial(
        _copy_loss_kernel,
        vocab_size=vocab_size, unk_index=unk_index, ignore_index=ignore_index,
        eps=eps, force_copy=bool(force_copy))

    itemsize = jnp.dtype(scores.dtype).itemsize
    cost = pl.CostEstimate(
        flops=6 * N * Vd,                # compares + selects + adds
        transcendentals=N,               # one log per row
        bytes_accessed=N * Vd * itemsize + 3 * N * 4)

    loss2 = pl.pallas_call(
        kernel,
        out_shape=jax.ShapeDtypeStruct((N, 1), jnp.float32),
        grid_spec=pltpu.PrefetchScalarGridSpec(
            num_scalar_prefetch=0,
            grid=grid,
            in_specs=[
                pl.BlockSpec((tn, tv), lambda i, j: (i, j)),   # scores tile (streamed once)
                pl.BlockSpec((tn, 1), lambda i, j: (i, 0)),    # target (resident per row tile)
                pl.BlockSpec((tn, 1), lambda i, j: (i, 0)),    # align
            ],
            out_specs=pl.BlockSpec((tn, 1), lambda i, j: (i, 0)),
            scratch_shapes=[pltpu.VMEM((tn, acc_w), jnp.float32),   # vocab_probs partials
                            pltpu.VMEM((tn, acc_w), jnp.float32)],  # copy_tok partials
        ),
        compiler_params=pltpu.CompilerParams(
            dimension_semantics=("parallel", "arbitrary"),
            vmem_limit_bytes=32 * 1024 * 1024),
        cost_estimate=cost,
    )(scores, target2, align2)

    return loss2[:, 0]


# ---------------------------------------------------------------------------
# Pure-JAX reference (mirrors the PyTorch forward exactly)
# ---------------------------------------------------------------------------
def copy_generator_loss_ref(scores, align, target, *, vocab_size, force_copy,
                            unk_index=0, ignore_index=-100, eps=1e-20):
    vocab_probs = jnp.take_along_axis(scores, target[:, None], axis=1)[:, 0]
    copy_tok = jnp.take_along_axis(scores, (align + vocab_size)[:, None], axis=1)[:, 0]
    copy_tok = jnp.where(align == unk_index, 0.0, copy_tok) + eps
    non_copy = align == unk_index
    if not force_copy:
        non_copy = non_copy | (target != unk_index)
    probs = jnp.where(non_copy, copy_tok + vocab_probs, copy_tok)
    loss = -jnp.log(probs)
    return jnp.where(target == ignore_index, 0.0, loss)


if __name__ == "__main__":
    # Small shapes consistent with the loss signature:
    #   scores: (batch*tgt_len, vocab_size + extended_vocab), align/target: (batch*tgt_len,)
    batch, tlen = 2, 8
    vocab_size = 256            # fixed target-vocab size
    cvocab = 200                # dynamic/extended vocab size
    N = batch * tlen
    Vd = vocab_size + cvocab    # 456 -> tv=384: 2 vocab tiles, ragged last tile (exercises masking)

    unk_index = 0
    ignore_index = 1            # OpenNMT passes the (valid) pad id here, not -100
    force_copy = False
    eps = 1e-20

    key = jax.random.PRNGKey(0)
    k = jax.random.split(key, 3)

    # scores are probabilities produced by CopyGenerator (positive, rows sum to 1)
    scores = jax.nn.softmax(jax.random.normal(k[0], (N, Vd), dtype=jnp.float32), axis=1)
    target = jax.random.randint(k[1], (N,), 0, vocab_size, dtype=jnp.int32)
    align = jax.random.randint(k[2], (N,), 0, cvocab, dtype=jnp.int32)

    # Force coverage of the special cases:
    target = target.at[0].set(unk_index)       # unk target -> copy branch matters
    target = target.at[1].set(ignore_index)    # ignored position -> zero loss
    align = align.at[2].set(unk_index)         # unk align -> copy prob zeroed

    out = copy_generator_loss(
        scores, align, target,
        vocab_size=vocab_size, force_copy=force_copy,
        unk_index=unk_index, ignore_index=ignore_index, eps=eps)
    out = jax.block_until_ready(out)

    ref = copy_generator_loss_ref(
        scores, align, target,
        vocab_size=vocab_size, force_copy=force_copy,
        unk_index=unk_index, ignore_index=ignore_index, eps=eps)

    assert out.shape == (N,)
    assert jnp.allclose(out, ref, rtol=1e-5, atol=1e-6), "mismatch vs reference"

    print("KERNEL_OK")
</pallas_src>

<mosaic_0001>
module attributes {stable_mosaic.version = 11 : i64} {
  func.func @_copy_loss_kernel(%arg0: i32, %arg1: i32, %arg2: memref<16x384xf32, #tpu.memory_space<vmem>>, %arg3: memref<16x1xi32, #tpu.memory_space<vmem>>, %arg4: memref<16x1xi32, #tpu.memory_space<vmem>>, %arg5: memref<16x1xf32, #tpu.memory_space<vmem>>, %arg6: memref<16x128xf32, #tpu.memory_space<vmem>>, %arg7: memref<16x128xf32, #tpu.memory_space<vmem>>) attributes {dimension_semantics = [#tpu.dimension_semantics<parallel>, #tpu.dimension_semantics<arbitrary>], iteration_bounds = array<i64: 1, 2>, scalar_prefetch = 0 : i64, scratch_operands = 2 : i64, tpu.core_type = #tpu.core_type<tc>, window_params = [{transform_indices = @transform_0, window_bounds = array<i64: 16, 384>}, {transform_indices = @transform_1, window_bounds = array<i64: 16, 1>}, {transform_indices = @transform_2, window_bounds = array<i64: 16, 1>}, {transform_indices = @transform_3, window_bounds = array<i64: 16, 1>}]} {
    %c0_i32 = arith.constant 0 : i32
    %0 = arith.cmpi eq, %arg1, %c0_i32 : i32
    %1 = arith.extui %0 : i1 to i32
    %c0_i32_0 = arith.constant 0 : i32
    %2 = arith.cmpi ne, %1, %c0_i32_0 : i32
    scf.if %2 {
      %cst_16 = arith.constant 0.000000e+00 : f32
      %41 = vector.broadcast %cst_16 : f32 to vector<16x128xf32>
      %c0_17 = arith.constant 0 : index
      %c0_18 = arith.constant 0 : index
      %42 = vector.load %arg6[%c0_17, %c0_18] : memref<16x128xf32, #tpu.memory_space<vmem>>, vector<16x128xf32>
      tpu.vector_store %arg6[%c0_17, %c0_18], %41 {strides = array<i32>} : memref<16x128xf32, #tpu.memory_space<vmem>>, vector<16x128xf32>,
      %cst_19 = arith.constant 0.000000e+00 : f32
      %43 = vector.broadcast %cst_19 : f32 to vector<16x128xf32>
      %c0_20 = arith.constant 0 : index
      %c0_21 = arith.constant 0 : index
      %44 = vector.load %arg7[%c0_20, %c0_21] : memref<16x128xf32, #tpu.memory_space<vmem>>, vector<16x128xf32>
      tpu.vector_store %arg7[%c0_20, %c0_21], %43 {strides = array<i32>} : memref<16x128xf32, #tpu.memory_space<vmem>>, vector<16x128xf32>,
    } else {
    }
    %c0 = arith.constant 0 : index
    %c0_1 = arith.constant 0 : index
    %3 = vector.load %arg2[%c0, %c0_1] : memref<16x384xf32, #tpu.memory_space<vmem>>, vector<16x384xf32>
    %c0_2 = arith.constant 0 : index
    %c0_3 = arith.constant 0 : index
    %4 = vector.load %arg3[%c0_2, %c0_3] : memref<16x1xi32, #tpu.memory_space<vmem>>, vector<16x1xi32>
    %c0_4 = arith.constant 0 : index
    %c0_5 = arith.constant 0 : index
    %5 = vector.load %arg4[%c0_4, %c0_5] : memref<16x1xi32, #tpu.memory_space<vmem>>, vector<16x1xi32>
    %c384_i32 = arith.constant 384 : i32
    %6 = arith.muli %arg1, %c384_i32 : i32
    %7 = vector.broadcast %6 : i32 to vector<16x1xi32>
    %8 = arith.subi %4, %7 : vector<16x1xi32>
    %c256_i32 = arith.constant 256 : i32
    %9 = vector.broadcast %c256_i32 : i32 to vector<16x1xi32>
    %10 = arith.addi %5, %9 : vector<16x1xi32>
    %11 = vector.broadcast %6 : i32 to vector<16x1xi32>
    %12 = arith.subi %10, %11 : vector<16x1xi32>
    %13 = tpu.iota {dimensions = array<i32: 1>} : vector<16x384xi32>
    %14 = vector.broadcast %8 : vector<16x1xi32> to vector<16x384xi32>
    %15 = arith.cmpi eq, %13, %14 : vector<16x384xi32>
    %cst = arith.constant 0.000000e+00 : f32
    %16 = vector.broadcast %cst : f32 to vector<16x384xf32>
    %17 = arith.select %15, %3, %16 : vector<16x384xi1>, vector<16x384xf32>
    %18 = vector.broadcast %12 : vector<16x1xi32> to vector<16x384xi32>
    %19 = arith.cmpi eq, %13, %18 : vector<16x384xi32>
    %cst_6 = arith.constant 0.000000e+00 : f32
    %20 = vector.broadcast %cst_6 : f32 to vector<16x384xf32>
    %21 = arith.select %19, %3, %20 : vector<16x384xi1>, vector<16x384xf32>
    %c0_7 = arith.constant 0 : index
    %c0_8 = arith.constant 0 : index
    %22 = vector.load %arg6[%c0_7, %c0_8] : memref<16x128xf32, #tpu.memory_space<vmem>>, vector<16x128xf32>
    %c0_9 = arith.constant 0 : index
    %c0_10 = arith.constant 0 : index
    %23 = vector.load %arg7[%c0_9, %c0_10] : memref<16x128xf32, #tpu.memory_space<vmem>>, vector<16x128xf32>
    %24 = vector.extract_strided_slice %17 {offsets = [0, 0], sizes = [16, 128], strides = [1, 1]} : vector<16x384xf32> to vector<16x128xf32>
    %25 = arith.addf %22, %24 : vector<16x128xf32>
    %26 = vector.extract_strided_slice %21 {offsets = [0, 0], sizes = [16, 128], strides = [1, 1]} : vector<16x384xf32> to vector<16x128xf32>
    %27 = arith.addf %23, %26 : vector<16x128xf32>
    %28 = vector.extract_strided_slice %17 {offsets = [0, 128], sizes = [16, 128], strides = [1, 1]} : vector<16x384xf32> to vector<16x128xf32>
    %29 = arith.addf %25, %28 : vector<16x128xf32>
    %30 = vector.extract_strided_slice %21 {offsets = [0, 128], sizes = [16, 128], strides = [1, 1]} : vector<16x384xf32> to vector<16x128xf32>
    %31 = arith.addf %27, %30 : vector<16x128xf32>
    %32 = vector.extract_strided_slice %17 {offsets = [0, 256], sizes = [16, 128], strides = [1, 1]} : vector<16x384xf32> to vector<16x128xf32>
    %33 = arith.addf %29, %32 : vector<16x128xf32>
    %34 = vector.extract_strided_slice %21 {offsets = [0, 256], sizes = [16, 128], strides = [1, 1]} : vector<16x384xf32> to vector<16x128xf32>
    %35 = arith.addf %31, %34 : vector<16x128xf32>
    %c0_11 = arith.constant 0 : index
    %c0_12 = arith.constant 0 : index
    %36 = vector.load %arg6[%c0_11, %c0_12] : memref<16x128xf32, #tpu.memory_space<vmem>>, vector<16x128xf32>
    tpu.vector_store %arg6[%c0_11, %c0_12], %33 {strides = array<i32>} : memref<16x128xf32, #tpu.memory_space<vmem>>, vector<16x128xf32>,
    %c0_13 = arith.constant 0 : index
    %c0_14 = arith.constant 0 : index
    %37 = vector.load %arg7[%c0_13, %c0_14] : memref<16x128xf32, #tpu.memory_space<vmem>>, vector<16x128xf32>
    tpu.vector_store %arg7[%c0_13, %c0_14], %35 {strides = array<i32>} : memref<16x128xf32, #tpu.memory_space<vmem>>, vector<16x128xf32>,
    %c1_i32 = arith.constant 1 : i32
    %38 = arith.cmpi eq, %arg1, %c1_i32 : i32
    %39 = arith.extui %38 : i1 to i32
    %c0_i32_15 = arith.constant 0 : i32
    %40 = arith.cmpi ne, %39, %c0_i32_15 : i32
    scf.if %40 {
      %c0_16 = arith.constant 0 : index
      %c0_17 = arith.constant 0 : index
      %41 = vector.load %arg6[%c0_16, %c0_17] : memref<16x128xf32, #tpu.memory_space<vmem>>, vector<16x128xf32>
      %cst_18 = arith.constant dense<0.000000e+00> : vector<16xf32>
      %42 = vector.multi_reduction <add>, %41, %cst_18 [1] : vector<16x128xf32> to vector<16xf32>
      %43 = vector.shape_cast %42 : vector<16xf32> to vector<16x1xf32>
      %c0_19 = arith.constant 0 : index
      %c0_20 = arith.constant 0 : index
      %44 = vector.load %arg7[%c0_19, %c0_20] : memref<16x128xf32, #tpu.memory_space<vmem>>, vector<16x128xf32>
      %cst_21 = arith.constant dense<0.000000e+00> : vector<16xf32>
      %45 = vector.multi_reduction <add>, %44, %cst_21 [1] : vector<16x128xf32> to vector<16xf32>
      %46 = vector.shape_cast %45 : vector<16xf32> to vector<16x1xf32>
      %c0_i32_22 = arith.constant 0 : i32
      %47 = vector.broadcast %c0_i32_22 : i32 to vector<16x1xi32>
      %48 = arith.cmpi eq, %5, %47 : vector<16x1xi32>
      %cst_23 = arith.constant 0.000000e+00 : f32
      %49 = vector.broadcast %cst_23 : f32 to vector<16x1xf32>
      %50 = arith.select %48, %49, %46 : vector<16x1xi1>, vector<16x1xf32>
      %cst_24 = arith.constant 9.99999968E-21 : f32
      %51 = vector.broadcast %cst_24 : f32 to vector<16x1xf32>
      %52 = arith.addf %50, %51 : vector<16x1xf32>
      %c0_i32_25 = arith.constant 0 : i32
      %53 = vector.broadcast %c0_i32_25 : i32 to vector<16x1xi32>
      %54 = arith.cmpi ne, %4, %53 : vector<16x1xi32>
      %55 = arith.ori %48, %54 : vector<16x1xi1>
      %56 = arith.addf %52, %43 : vector<16x1xf32>
      %57 = arith.select %55, %56, %52 : vector<16x1xi1>, vector<16x1xf32>
      %58 = math.log %57 : vector<16x1xf32>
      %cst_26 = arith.constant 0.000000e+00 : f32
      %59 = vector.broadcast %cst_26 : f32 to vector<16x1xf32>
      %60 = arith.subf %59, %58 : vector<16x1xf32>
      %c1_i32_27 = arith.constant 1 : i32
      %61 = vector.broadcast %c1_i32_27 : i32 to vector<16x1xi32>
      %62 = arith.cmpi eq, %4, %61 : vector<16x1xi32>
      %cst_28 = arith.constant 0.000000e+00 : f32
      %63 = vector.broadcast %cst_28 : f32 to vector<16x1xf32>
      %64 = arith.select %62, %63, %60 : vector<16x1xi1>, vector<16x1xf32>
      %c0_29 = arith.constant 0 : index
      %c0_30 = arith.constant 0 : index
      %65 = vector.load %arg5[%c0_29, %c0_30] : memref<16x1xf32, #tpu.memory_space<vmem>>, vector<16x1xf32>
      tpu.vector_store %arg5[%c0_29, %c0_30], %64 {strides = array<i32>} : memref<16x1xf32, #tpu.memory_space<vmem>>, vector<16x1xf32>,
    } else {
    }
    return
  }
  func.func @transform_0(%arg0: i32, %arg1: i32) -> (i32, i32) {
    %c0_i32 = arith.constant 0 : i32
    return %arg0, %arg1 : i32, i32
  }
  func.func @transform_1(%arg0: i32, %arg1: i32) -> (i32, i32) {
    %c0_i32 = arith.constant 0 : i32
    %c0_i32_0 = arith.constant 0 : i32
    return %arg0, %c0_i32 : i32, i32
  }
  func.func @transform_2(%arg0: i32, %arg1: i32) -> (i32, i32) {
    %c0_i32 = arith.constant 0 : i32
    %c0_i32_0 = arith.constant 0 : i32
    return %arg0, %c0_i32 : i32, i32
  }
  func.func @transform_3(%arg0: i32, %arg1: i32) -> (i32, i32) {
    %c0_i32 = arith.constant 0 : i32
    %c0_i32_0 = arith.constant 0 : i32
    return %arg0, %c0_i32 : i32, i32
  }
}

</mosaic_0001>

<bundles_post_ra>
// kernel: tpu_custom_call.1
= control target key start
LH: loop header
LB: loop body
LE: loop exit
PB: predicated region body
PF: predicated region fallthrough
CT: control target
= control target key end

     0   :  { %8 = vsyncpa [#allocation5], 0  ;;  %s856_s0 = inlined_call_operand.hbm [shape: f32[16,456], index: 0, kind: input, shape index: {}]   ;;  %s857_s1 = inlined_call_operand.vmem [shape: s32[16,1], index: 1, kind: input, shape index: {}]   ;;  %s858_s2 = inlined_call_operand.vmem [shape: s32[16,1], index: 2, kind: input, shape index: {}]   ;;  %s859_s3 = inlined_call_operand.vmem [shape: f32[16,1], index: 3, kind: output, shape index: {}]  }
   0x1   :  { %10 = vsyncpa [#allocation5 + $0x1], 0  ;;  %s688_s12 = smov 0   ;;  %s690_s13 = smov 0  }
   0x2   :  { %s692_s14 = smov 0   ;;  %s694_s15 = smov 0  }
   0x3   :  { %s696_s16 = smov 0   ;;  %s698_s17 = smov 0  }
   0x4 LB: > { %s501_s18 = sadd.s32 4294967295, %s661_s17   ;;  %s25_s19 = sadd.s32 1, %s657_s16  ;;  %s661_s17 = sphi %s698_s17, %s16_s17   ;;  %s657_s16 = sphi %s696_s16, %s865_s16   ;;  %s653_s15 = sphi %s694_s15, %s864_s15   ;;  %s649_s14 = sphi %s692_s14, %s863_s14   ;;  %s645_s13 = sphi %s690_s13, %s862_s13   ;;  %s641_s12 = sphi %s688_s12, %s861_s12  }
   0x5   : > { %p26_p0 = scmp.ge.s32.totalorder %s25_s19, 2  ;;  %s37_s20 = sadd.s32 1, %s649_s14 }
   0x6   : > { %p44_p1 = scmp.ne.s32.totalorder %s649_s14, %s645_s13  ;;  %p45_p2 = scmp.eq.s32.totalorder %s661_s17, 0 }
   0x7   : > { %s867_s19 = smov (%p26_p0, %s25_s19), 0  ;;  %p50_p4 = scmp.ne.s32.totalorder %s645_s13, %s641_s12 }
   0x8   : > { %p46_p3 = por %p45_p2, %p44_p1  ;;  %s33_s21 = ssub.s32 %s657_s16, %s867_s19 }
   0x9   : > { %p51_p5 = scmp.eq.s32.totalorder %s501_s18, 0  ;;  %p35_p6 = scmp.eq.s32.totalorder %s33_s21, 0 }
   0xa   : > { %p505_p8 = scmp.ge.s32.totalorder %s661_s17, 2 }
   0xb   : > { %p727_p7 = por %p51_p5, %p50_p4 }
   0xc   : > { %s732_s23 = scalar_select %p35_p6, %s649_s14, %s37_s20  }
   0xd   : > { %166 = sbr.rel (%p505_p8) target bundleno = 55 (0x37), region = 24 }
  0x14   : > { %169 = sbr.rel (!%p46_p3) target bundleno = 55 (0x37), region = 28  ;;  %s170_s24 = sand.u32 (%p46_p3), 1, %s649_s14  }
  0x15   : > { %s176_s25 = smul.u32 (%p46_p3), 3, %s657_s16  ;;  %s743_s30 = scalar_lea.sflag (%p46_p3), [#allocation5], %s170_s24 }
  0x16   : > { %s522_s26 = smul.u32 (%p46_p3), 48, %s170_s24 }
  0x17   : > { %s177_s27 = ssub.s32 (%p46_p3), 4, %s176_s25 }
  0x18   : > { %p178_p9 = scmp.lt.s32.totalorder (%p46_p3), %s177_s27, 3  ;;  %s174_s4 = scalar_lea.vmem (%p46_p3), [#allocation4], %s522_s26 }
  0x1b   : > { %s869_s27 = smov (!%p178_p9, %s177_s27), 3 }
  0x1c   : > { %s740_s28 = sshll.u32 %s869_s27, 8 }
  0x1d   : > { %s182_s29 = ssub.s32 768, %s740_s28 }
  0x1e   : > { %183 = vsyncadd %s743_s30, %s182_s29  ;;  %p507_p10 = scmp.ne.s32.totalorder %s740_s28, 0  ;;  %s519_s5 = smul.u32 384, %s657_s16 }
  0x1f   : > { %s509_s6 = sshll.u32 %s869_s27, 3  ;;  %s191_s7 = sshll.u32 %s174_s4, 4  ;;  %s754_s7 = int_to_ptr.vmem [resolvable:$true] %s191_s7 }
  0x20   : > { %s752_s10 = scalar_lea.hbm %s856_s0, %s519_s5  ;;  %s587_s20 = scalar_lea.hbm %s856_s0, 1024 }
  0x21   : > { %s583_s11 = scalar_lea.hbm %s752_s10, %s740_s28  ;;  %p588_p0 = scmp.lt.u32.totalorder %s752_s10, %s856_s0 }
  0x22   : > { %p584_p11 = scmp.ne.s32.totalorder %s752_s10, %s583_s11  ;;  %p589_p1 = scmp.lt.u32.totalorder %s587_s20, %s583_s11 }
  0x23   : > { %p591_p3 = scmp.lt.u32.totalorder %s583_s11, %s752_s10 }
  0x24   : > { %p585_p12 = pnand %p584_p11, %p507_p10  ;;  %p590_p2 = por %p589_p1, %p588_p0 }
  0x26   : > { %p586_p13 = pneg %p585_p12  ;;  %p592_p4 = por %p591_p3, %p590_p2 }
  0x28   : > { %p593_p5 = pnand %p592_p4, %p586_p13 }
  0x2a   : > { %596 = shalt.err (!%p593_p5)
}
  0x2b   : > { %s597_s25 = scalar_lea.vmem %s754_s7, %s740_s28  ;;  %s663_s26 = smov [#allocation4]  }
  0x2c   : > { %p598_p6 = scmp.ne.s32.totalorder %s754_s7, %s597_s25  ;;  %s601_s29 = sshll.u32 %s663_s26, 4  ;;  %s602_s29 = int_to_ptr.vmem [resolvable:$false] %s601_s29 }
  0x2d   : > { %s603_s4 = scalar_lea.vmem %s602_s29, 1536  ;;  %p604_p11 = scmp.lt.s32.totalorder %s754_s7, %s602_s29 }
  0x2e   : > { %p599_p8 = pnand %p598_p6, %p507_p10  ;;  %p605_p12 = scmp.lt.s32.totalorder %s603_s4, %s597_s25 }
  0x30   : > { %p600_p9 = pneg %p599_p8  ;;  %p606_p0 = por %p605_p12, %p604_p11 }
  0x32   : > { %p607_p1 = pnand %p606_p0, %p600_p9 }
  0x34   : > { %610 = shalt.err (!%p607_p1)
}
  0x35   : > { %s664_s5 = smov 512   ;;  %s665_s8 = smov 384  }
  0x36   : > { %197 = dma.hbm_to_vmem [thread:$0]  (%p507_p10), %s752_s10, %s740_s28, %s754_s7, %s743_s30, %s664_s5, %s665_s8, %s509_s6  }
  0x37 PF: > { %p512_p13 = scmp.ge.s32.totalorder %s661_s17, 1  ;;  %p199_p2 = scmp.lt.s32.totalorder %s661_s17, 3 }
  0x39   : > { %p200_p3 = pnand %p512_p13, %p199_p2 }
  0x3a   : > { %s205_s9 = sand.u32 (!%p200_p3), 1, %s645_s13  }
  0x3b   : > { %203 = sbr.rel (%p200_p3) target bundleno = 394 (0x18a), region = 32  ;;  %s206_s12 = scalar_lea.sflag (!%p200_p3), [#allocation5], %s205_s9 }
  0x3c   : > { %s523_s11 = smul.u32 (!%p200_p3), 48, %s205_s9 }
  0x3e   : > { %s786_s18 = scalar_lea.vmem (!%p200_p3), [#allocation4], %s523_s11 }
  0x42   : > { %636 = dma.done.wait (%p727_p7), %s206_s12, 768  }
  0x43   : > { %638 = vsyncadd (%p727_p7), %s206_s12, 4294966528  ;;  %p513_p10 = scmp.ne.s32.totalorder %s653_s15, 0 }
  0x44   : > { %v666_v0 = vmov (!%p513_p10), 0.0  }
  0x45   : > { %269 = sbr.rel (%p513_p10) target bundleno = 76 (0x4c), region = 40  ;;  %270 = vst [vmem:[#allocation2] sm:$0xff] (!%p513_p10), %v666_v0  ;;  %271 = vst [vmem:[#allocation2 + $0x8] sm:$0xff] (!%p513_p10), %v666_v0 }
  0x46   : > { %272 = vst [vmem:[#allocation3] sm:$0xff] (!%p513_p10), %v666_v0  ;;  %273 = vst [vmem:[#allocation3 + $0x8] sm:$0xff] (!%p513_p10), %v666_v0 }
  0x4c PF: > { %v796_v1 = vld [vmem:[%s858_s2] sm:$0xff]  ;;  %s284_s30 = smul.u32 384, %s653_s15  ;;  %v807_v3 = vld [vmem:[%s858_s2 + $0x8] sm:$0xff]  ;;  %v667_v4 = vmov 0   ;;  %v292_v13 = vlaneseq  ;;  %p514_p7 = scmp.ne.s32.totalorder %s653_s15, 1 }
  0x4d   : > { %v802_v2 = vld [vmem:[%s857_s1] sm:$0xff]  ;;  %578 = vset.pattern.permute.xlu1 %v667_v4  ;;  %577 = vset.pattern.permute.xlu0 %v667_v4  ;;  %v288_v5 = vadd.s32 256, %v796_v1  ;;  %v289_v6 = vadd.s32 256, %v807_v3  ;;  %v814_v8 = vld [vmem:[%s857_s1 + $0x8] sm:$0xff]  ;;  %v334_v18 = vld [vmem:[#allocation3] sm:$0xff]  ;;  %vm368_vm12 = vcmp.eq.s32.totalorder (!%p514_p7), %v796_v1, 0 }
  0x4e   : > { %v285_v7 = vstv %s284_s30  ;;  %v293_v14 = vand.u32 127, %v292_v13  ;;  %v274_v17 = vld [vmem:[%s786_s18] sm:$0xff]  ;;  %v275_v21 = vld [vmem:[%s786_s18 + $0x8] sm:$0xff]  ;;  %v276_v22 = vld [vmem:[%s786_s18 + $0x10] sm:$0xff]  ;;  %vm374_vm13 = vcmp.ne.s32.totalorder (!%p514_p7), %v802_v2, 0  ;;  %vm369_vm14 = vcmp.eq.s32.totalorder (!%p514_p7), %v807_v3, 0 }
  0x4f   : > { %v290_v9 = vsub.s32 %v288_v5, %v285_v7  ;;  %v286_v10 = vsub.s32 %v802_v2, %v285_v7  ;;  %v291_v11 = vsub.s32 %v289_v6, %v285_v7  ;;  %v287_v12 = vsub.s32 %v814_v8, %v285_v7  ;;  %v332_v23 = vld [vmem:[#allocation2] sm:$0xff]  ;;  %v277_v27 = vld [vmem:[%s786_s18 + $0x18] sm:$0xff]  ;;  %v279_v42 = vld [vmem:[%s786_s18 + $0x28] sm:$0xff] }
  0x50   : > { %v294_v15 = vadd.s32 128, %v293_v14  ;;  %v295_v16 = vadd.s32 256, %v293_v14  ;;  %v335_v31 = vld [vmem:[#allocation3 + $0x8] sm:$0xff]  ;;  %v278_v36 = vld [vmem:[%s786_s18 + $0x20] sm:$0xff]  ;;  %v333_v40 = vld [vmem:[#allocation2 + $0x8] sm:$0xff] }
  0x51   : > { %315 = vperm.xlu1 %578, %v290_v9   ;;  %297 = vperm.xlu0 %577, %v286_v10   ;;  %vm376_vm15 = vmor (!%p514_p7), %vm368_vm12, %vm374_vm13 }
  0x55   : > { %318 = vperm.xlu1 %578, %v291_v11   ;;  %300 = vperm.xlu0 %577, %v287_v12  }
  0xd0   : > { %v316_v19 = vpop.permute.xlu1 %315  ;;  %v298_v20 = vpop.permute.xlu0 %297 }
  0xd1   : > { %vm320_vm0 = vcmp.eq.s32.totalorder %v293_v14, %v316_v19  ;;  %vm321_vm1 = vcmp.eq.s32.totalorder %v294_v15, %v316_v19  ;;  %vm322_vm2 = vcmp.eq.s32.totalorder %v295_v16, %v316_v19  ;;  %vm302_vm3 = vcmp.eq.s32.totalorder %v293_v14, %v298_v20 }
  0xd2   : > { %v326_v24 = vsel %vm320_vm0, %v274_v17, 0.0  ;;  %vm303_vm4 = vcmp.eq.s32.totalorder %v294_v15, %v298_v20  ;;  %vm304_vm5 = vcmp.eq.s32.totalorder %v295_v16, %v298_v20  ;;  %v308_v26 = vsel %vm302_vm3, %v274_v17, 0.0 }
  0xd3   : > { %v338_v25 = vadd.f32 %v334_v18, %v326_v24  ;;  %v327_v28 = vsel %vm321_vm1, %v275_v21, 0.0  ;;  %v328_v29 = vsel %vm322_vm2, %v276_v22, 0.0  ;;  %v336_v30 = vadd.f32 %v332_v23, %v308_v26 }
  0xd4   : > { %v319_v32 = vpop.permute.xlu1 %318  ;;  %v301_v33 = vpop.permute.xlu0 %300  ;;  %v309_v35 = vsel %vm303_vm4, %v275_v21, 0.0  ;;  %v310_v37 = vsel %vm304_vm5, %v276_v22, 0.0  ;;  %vm375_vm0 = vcmp.ne.s32.totalorder (!%p514_p7), %v814_v8, 0  ;;  %vm388_vm2 = vcmp.eq.s32.totalorder (!%p514_p7), %v802_v2, 1 }
  0xd5   : > { %v342_v34 = vadd.f32 %v338_v25, %v327_v28  ;;  %vm323_vm6 = vcmp.eq.s32.totalorder %v293_v14, %v319_v32  ;;  %vm324_vm7 = vcmp.eq.s32.totalorder %v294_v15, %v319_v32  ;;  %v340_v38 = vadd.f32 %v336_v30, %v309_v35  ;;  %vm377_vm1 = vmor (!%p514_p7), %vm369_vm14, %vm375_vm0 }
  0xd6   : > { %vm325_vm8 = vcmp.eq.s32.totalorder %v295_v16, %v319_v32  ;;  %v329_v39 = vsel %vm323_vm6, %v277_v27, 0.0  ;;  %vm305_vm9 = vcmp.eq.s32.totalorder %v293_v14, %v301_v33  ;;  %vm306_vm10 = vcmp.eq.s32.totalorder %v294_v15, %v301_v33 }
  0xd7   : > { %v346_v41 = vadd.f32 %v342_v34, %v328_v29  ;;  %v339_v43 = vadd.f32 %v335_v31, %v329_v39  ;;  %v344_v44 = vadd.f32 %v340_v38, %v310_v37  ;;  %v330_v45 = vsel %vm324_vm7, %v278_v36, 0.0 }
  0xd8   : > { %v311_v46 = vsel %vm305_vm9, %v277_v27, 0.0  ;;  %vm307_vm11 = vcmp.eq.s32.totalorder %v295_v16, %v301_v33  ;;  %v331_v49 = vsel %vm325_vm8, %v279_v42, 0.0  ;;  %v312_v50 = vsel %vm306_vm10, %v278_v36, 0.0 }
  0xd9   : > { %350 = vst [vmem:[#allocation3] sm:$0xff] %v346_v41  ;;  %v343_v47 = vadd.f32 %v339_v43, %v330_v45  ;;  %v337_v48 = vadd.f32 %v333_v40, %v311_v46  ;;  %348 = vst [vmem:[#allocation2] sm:$0xff] %v344_v44  ;;  %v313_v53 = vsel %vm307_vm11, %v279_v42, 0.0  ;;  %355 = sbr.rel (%p514_p7) target bundleno = 394 (0x18a), region = 44  ;;  %vm392_vm3 = vcmask (!%p514_p7), 7168  }
  0xda   : > { %vm389_vm4 = vcmp.eq.s32.totalorder (!%p514_p7), %v814_v8, 1 }
  0xdb   : > { %v347_v51 = vadd.f32 %v343_v47, %v331_v49  ;;  %v341_v52 = vadd.f32 %v337_v48, %v312_v50 }
  0xdd   : > { %351 = vst [vmem:[#allocation3 + $0x8] sm:$0xff] %v347_v51  ;;  %v345_v54 = vadd.f32 %v341_v52, %v313_v53 }
  0xdf   : > { %349 = vst [vmem:[#allocation2 + $0x8] sm:$0xff] %v345_v54 }
  0xe0   : > { %v362_v55 = vld [vmem:[#allocation3] sm:$0xff]  ;;  %v356_v56 = vld [vmem:[#allocation2] sm:$0xff] }
  0xe1   : > { %364 = vadd.xlane.f32.xlu0 %v362_v55  ;;  %358 = vadd.xlane.f32.xlu1 %v356_v56 }
  0xe4   : > { %v363_v57 = vld [vmem:[#allocation3 + $0x8] sm:$0xff] }
  0xe5   : > { %366 = vadd.xlane.f32.xlu0 %v363_v57 }
  0xe6   : > { %v357_v58 = vld [vmem:[#allocation2 + $0x8] sm:$0xff] }
  0xe7   : > { %360 = vadd.xlane.f32.xlu1 %v357_v58 }
 0x16e   : > { %v365_v59 = vpop.xlane.xlu0 %364  ;;  %v359_v60 = vpop.xlane.xlu1 %358 }
 0x16f   : > { %v370_v61 = vsel %vm368_vm12, 0.0, %v365_v59 }
 0x170   : > { %v372_v62 = vadd.f32 1e-20, %v370_v61 }
 0x172   : > { %v378_v63 = vadd.f32 %v372_v62, %v359_v60  ;;  %v367_v0 = vpop.xlane.xlu0 %366 }
 0x173   : > { %v371_v4 = vsel %vm369_vm14, 0.0, %v367_v0 }
 0x174   : > { %v361_v5 = vpop.xlane.xlu1 %360  ;;  %v380_v6 = vsel %vm376_vm15, %v378_v63, %v372_v62  ;;  %v373_v7 = vadd.f32 1e-20, %v371_v4 }
 0x175   : > { %579 = vlog2.f32 %v380_v6 }
 0x176   : > { %v379_v1 = vadd.f32 %v373_v7, %v361_v5 }
 0x178   : > { %v381_v9 = vsel %vm377_vm1, %v379_v1, %v373_v7 }
 0x179   : > { %581 = vlog2.f32 %v381_v9 }
 0x17f   : > { %v580_v10 = vpop.eup %579 }
 0x180   : > { %v383_v11 = vmul.f32 0.6931472, %v580_v10 }
 0x182   : > { %v386_v3 = vsub.f32 0.0, %v383_v11 }
 0x183   : > { %v582_v12 = vpop.eup %581 }
 0x184   : > { %v390_v13 = vsel %vm388_vm2, 0.0, %v386_v3  ;;  %v385_v14 = vmul.f32 0.6931472, %v582_v12 }
 0x185   : > { %393 = vst.msk [vmem:[%s859_s3] sm:$0xff] %vm392_vm3, %v390_v13 }
 0x186   : > { %v387_v15 = vsub.f32 0.0, %v385_v14 }
 0x188   : > { %v391_v16 = vsel %vm389_vm4, 0.0, %v387_v15 }
 0x189   : > { %394 = vst.msk [vmem:[%s859_s3 + $0x8] sm:$0xff] %vm392_vm3, %v391_v16 }
 0x18a PF: > { %s16_s17 = sadd.s32 1, %s661_s17   ;;  %s861_s12 = smov %s645_s13 }
 0x18b   : > { %p13_p4 = scmp.ge.s32.totalorder %s16_s17, 4   ;;  %s862_s13 = smov %s649_s14 }
 0x18c   : > { %s863_s14 = smov %s732_s23  ;;  %s864_s15 = smov %s657_s16 }
 0x18d   : > { %s865_s16 = smov %s867_s19  ;;  %15 = sbr.rel (!%p13_p4) target bundleno = 4 (0x4), region = 86 }
 0x194   :  { %417 = vsyncpa [#allocation5], 1 }
 0x195   :  { %419 = vsyncpa [#allocation5 + $0x1], 1 }

</bundles_post_ra>
